<compile_context>
chip_gen: v6e
topology: v6e:2x2x1
jax: 0.10.0
libtpu: 0.0.40
codegen_flags: <defaults>
</compile_context>

<pallas_src>
import functools

import jax
import jax.numpy as jnp
from jax import lax
from jax.experimental import pallas as pl
from jax.experimental.pallas import tpu as pltpu


_VMEM_LIMIT_BYTES = 32 * 1024 * 1024    # above v5e's 16 MiB scoped default; safe on v6e/v7x
_TARGET_TILE_BYTES = 4 * 1024 * 1024    # ~4 MiB per in/out buffer -> ~16 MiB double-buffered


# ----------------------------------------------------------------------------
# Kernels
# ----------------------------------------------------------------------------
def _relu_kernel(x_ref, o_ref):
    # Lane-dense elementwise ReLU: unmasked full-lane stores on interior tiles,
    # pipeline-masked store only on a (single) ragged boundary tile.
    o_ref[...] = jnp.maximum(x_ref[...], 0).astype(o_ref.dtype)


def _relu_max_kernel(x_ref, o_ref, mx_ref, *, valid_leading, tile_leading):
    # ReLU + fused per-grid-step partial max (training path).  The boundary block
    # may be ragged and its OOB region holds undefined data, so mask it to 0.0
    # before the reduction (relu(x) >= 0, so 0 never raises the max).
    v = jnp.maximum(x_ref[...], 0)
    o_ref[...] = v.astype(o_ref.dtype)

    i = pl.program_id(0)
    n_valid = valid_leading - i * tile_leading
    vf = v.astype(jnp.float32)
    if vf.ndim == 1:
        # 1-D ragged path: mask on the flat element index (block is a multiple of 128).
        r = vf.reshape(-1, 128)
        ids = (lax.broadcasted_iota(jnp.int32, r.shape, 0) * 128
               + lax.broadcasted_iota(jnp.int32, r.shape, 1))
        masked = jnp.where(ids < n_valid, r, 0.0)
    else:
        # 2-D path: lanes always divide exactly, only the row axis can be ragged.
        ids = lax.broadcasted_iota(jnp.int32, vf.shape, 0)
        masked = jnp.where(ids < n_valid, vf, 0.0)
    mx_ref[...] = jnp.full(mx_ref.shape, jnp.max(masked), jnp.float32)


# ----------------------------------------------------------------------------
# Wrapper
# ----------------------------------------------------------------------------
def _choose_lanes(size):
    for cand in (1024, 512, 256, 128):
        if size % cand == 0:
            return cand
    return None


def relu_pallas(x, *, with_max=False):
    """ReLU via a lane-dense tiled Pallas kernel.

    Returns relu(x).  With with_max=True also returns the global f32 max of the
    output, computed from fused per-tile partial maxes (no second HBM pass).
    """
    orig_shape = x.shape
    dtype = x.dtype
    size = x.size

    if size == 0:  # guard: avoid zero-sized grid / divide-by-zero
        out = x
        return (out, jnp.zeros((), jnp.float32)) if with_max else out

    itemsize = jnp.dtype(dtype).itemsize
    # dtype-aware packed-row (sublane) granularity: 8 for 32-bit, 16 for 16-bit, 32 for 8-bit
    sublane = {4: 8, 2: 16, 1: 32}.get(itemsize, 8)

    flat = x.reshape(-1)                       # contiguous flatten, no copy
    lanes = _choose_lanes(size)

    if lanes is not None:
        # ---- lane-dense 2-D path: exact factorization, zero padding ----------
        rows = size // lanes
        target_rows = max(sublane, _TARGET_TILE_BYTES // (lanes * itemsize))
        if rows > target_rows:
            tile_rows = (target_rows // sublane) * sublane
        elif rows >= 2 * sublane:
            # small/medium input: prefer >=2 grid steps so both v7x TCs stream
            tile_rows = pl.cdiv(pl.cdiv(rows, 2), sublane) * sublane
        else:
            tile_rows = rows                   # full-dim single block (always legal)
        grid = pl.cdiv(rows, tile_rows)        # padding never exceeds one tile
        data = flat.reshape(rows, lanes)
        block = (tile_rows, lanes)
        leading, tile_leading = rows, tile_rows
    else:
        # ---- ragged element count: 1-D lane blocks, masked boundary block ----
        chunk = sublane * 128
        limit = min(_TARGET_TILE_BYTES // itemsize, pl.cdiv(size, 128) * 128)
        while chunk * 2 <= limit:
            chunk *= 2
        grid = pl.cdiv(size, chunk)
        data = flat
        block = (chunk,)
        leading, tile_leading = size, chunk

    zeros_tail = (0,) * (len(block) - 1)

    def idx(i):
        return (i,) + zeros_tail

    compiler_params = pltpu.CompilerParams(
        dimension_semantics=("parallel",),
        vmem_limit_bytes=_VMEM_LIMIT_BYTES,
    )

    if not with_max:
        out = pl.pallas_call(
            _relu_kernel,
            out_shape=jax.ShapeDtypeStruct(data.shape, dtype),
            grid=(grid,),
            in_specs=[pl.BlockSpec(block, idx)],
            out_specs=pl.BlockSpec(block, idx),
            compiler_params=compiler_params,
        )(data)
        return out.reshape(orig_shape)

    kernel = functools.partial(
        _relu_max_kernel, valid_leading=leading, tile_leading=tile_leading)
    out, part_max = pl.pallas_call(
        kernel,
        out_shape=(
            jax.ShapeDtypeStruct(data.shape, dtype),
            jax.ShapeDtypeStruct((grid, 8, 128), jnp.float32),   # per-tile partial maxes
        ),
        grid=(grid,),
        in_specs=[pl.BlockSpec(block, idx)],
        out_specs=(
            pl.BlockSpec(block, idx),
            pl.BlockSpec((1, 8, 128), lambda i: (i, 0, 0)),
        ),
        compiler_params=compiler_params,
    )(data)
    return out.reshape(orig_shape), jnp.max(part_max)


# ----------------------------------------------------------------------------
# Module-level glue (training-mode running min/max stats; pure JAX, not a kernel)
# ----------------------------------------------------------------------------
def _blend_min_max_stats(state, out_min, out_max, momentum):
    """Functional equivalent of QuantizedOperator.update_min_max_stats (training mode)."""
    eps = jnp.float32(1e-6)
    mn = jnp.minimum(-eps, jnp.asarray(out_min, jnp.float32))
    mx = jnp.maximum(eps, jnp.asarray(out_max, jnp.float32))
    first = state["num_batches_tracked"] == 0
    new_min = jnp.where(first, mn, mn * momentum + state["running_min"] * (1.0 - momentum))
    new_max = jnp.where(first, mx, mx * momentum + state["running_max"] * (1.0 - momentum))
    return {
        "running_min": new_min,
        "running_max": new_max,
        "num_batches_tracked": state["num_batches_tracked"] + 1,
    }


def quantized_relu_forward(x, *, training=False, state=None, momentum=0.1):
    """Forward of QuantizedReLU with activation_quantization=False.

    Returns relu(x); when training with a state dict, also returns the updated
    running min/max state (the PyTorch module mutates buffers instead).  The
    training path uses a fused ReLU+max kernel; since min(relu(x)) >= 0, the
    clamped running-min update is always -1e-6 and no min pass is needed.
    """
    if training and state is not None:
        if x.size == 0:
            return x, state
        out, out_max = relu_pallas(x, with_max=True)
        new_state = _blend_min_max_stats(state, jnp.zeros((), jnp.float32), out_max, momentum)
        return out, new_state
    return relu_pallas(x)


# ----------------------------------------------------------------------------
# Demo / self-check
# ----------------------------------------------------------------------------
if __name__ == "__main__":
    key = jax.random.PRNGKey(0)
    x = jax.random.normal(key, (2, 4, 16, 16), jnp.float32)
    ref = jnp.maximum(x, 0.0)

    # eval-mode forward (the value-returning hot path)
    out = quantized_relu_forward(x)
    out = jax.block_until_ready(out)
    assert out.shape == x.shape and out.dtype == x.dtype
    assert jnp.array_equal(out, ref)

    # bf16 input (dtype-aware tiling path)
    x_bf16 = x.astype(jnp.bfloat16)
    out_bf16 = jax.block_until_ready(quantized_relu_forward(x_bf16))
    assert out_bf16.dtype == jnp.bfloat16
    assert jnp.array_equal(out_bf16, jnp.maximum(x_bf16, 0))

    # training-mode forward: fused ReLU + max, functional buffer update
    state0 = {
        "running_min": jnp.zeros((), jnp.float32),
        "running_max": jnp.zeros((), jnp.float32),
        "num_batches_tracked": jnp.zeros((), jnp.int32),
    }
    out_t, state1 = quantized_relu_forward(x, training=True, state=state0)
    out_t = jax.block_until_ready(out_t)
    state1 = jax.tree_util.tree_map(jax.block_until_ready, state1)
    assert jnp.array_equal(out_t, ref)
    expected_max = jnp.maximum(jnp.float32(1e-6), jnp.max(ref))
    assert jnp.allclose(state1["running_max"], expected_max, rtol=1e-6)
    assert jnp.allclose(state1["running_min"], -1e-6)
    assert int(state1["num_batches_tracked"]) == 1

    print("KERNEL_OK")
</pallas_src>

<mosaic_0001>
module attributes {stable_mosaic.version = 11 : i64} {
  func.func @_relu_kernel(%arg0: i32, %arg1: memref<2x1024xf32, #tpu.memory_space<vmem>>, %arg2: memref<2x1024xf32, #tpu.memory_space<vmem>>) attributes {dimension_semantics = [#tpu.dimension_semantics<parallel>], iteration_bounds = array<i64: 1>, scalar_prefetch = 0 : i64, scratch_operands = 0 : i64, tpu.core_type = #tpu.core_type<tc>, window_params = [{transform_indices = @transform_0, window_bounds = array<i64: 2, 1024>}, {transform_indices = @transform_1, window_bounds = array<i64: 2, 1024>}]} {
    %c0 = arith.constant 0 : index
    %c0_0 = arith.constant 0 : index
    %0 = vector.load %arg1[%c0, %c0_0] : memref<2x1024xf32, #tpu.memory_space<vmem>>, vector<2x1024xf32>
    %cst = arith.constant 0.000000e+00 : f32
    %1 = vector.broadcast %cst : f32 to vector<2x1024xf32>
    %2 = arith.maximumf %0, %1 : vector<2x1024xf32>
    %c0_1 = arith.constant 0 : index
    %c0_2 = arith.constant 0 : index
    %3 = vector.load %arg2[%c0_1, %c0_2] : memref<2x1024xf32, #tpu.memory_space<vmem>>, vector<2x1024xf32>
    tpu.vector_store %arg2[%c0_1, %c0_2], %2 {strides = array<i32>} : memref<2x1024xf32, #tpu.memory_space<vmem>>, vector<2x1024xf32>,
    return
  }
  func.func @transform_0(%arg0: i32) -> (i32, i32) {
    %c0_i32 = arith.constant 0 : i32
    %c0_i32_0 = arith.constant 0 : i32
    return %arg0, %c0_i32 : i32, i32
  }
  func.func @transform_1(%arg0: i32) -> (i32, i32) {
    %c0_i32 = arith.constant 0 : i32
    %c0_i32_0 = arith.constant 0 : i32
    return %arg0, %c0_i32 : i32, i32
  }
}

</mosaic_0001>

<bundles_post_ra>
// kernel: tpu_custom_call.1
= control target key start
LH: loop header
LB: loop body
LE: loop exit
PB: predicated region body
PF: predicated region fallthrough
CT: control target
= control target key end

     0   :  { %6 = vsyncpa [#allocation3], 0  ;;  %s106_s0 = inlined_call_operand.hbm [shape: f32[2,1024], index: 0, kind: input, shape index: {}]   ;;  %s107_s1 = inlined_call_operand.hbm [shape: f32[2,1024], index: 1, kind: output, shape index: {}]  }
   0x1   :  { %7 = vsyncpa [#allocation4], 0  ;;  %s88_s6 = smov [#allocation2]  }
   0x2   :  { %s14_s7 = sshll.u32 %s88_s6, 4  ;;  %s15_s7 = int_to_ptr.vmem [resolvable:$true] %s14_s7 }
   0x3   :  { %s52_s8 = scalar_lea.vmem %s15_s7, 256  ;;  %p57_p1 = scmp.lt.s32.totalorder %s15_s7, %s15_s7 }
   0x4   :  { %p53_p0 = scmp.ne.s32.totalorder %s15_s7, %s52_s8  ;;  %p58_p2 = scmp.lt.s32.totalorder %s52_s8, %s52_s8 }
   0x6   :  { %p59_p3 = por %p58_p2, %p57_p1 }
   0x8   :  { %p60_p4 = pnand %p59_p3, %p53_p0 }
   0xa   :  { %63 = shalt.err (!%p60_p4)
}
   0xb   :  { %17 = dma.hbm_to_vmem [thread:$0]  %s106_s0, 256, %s15_s7, [#allocation3]  }
   0xc   :  { %84 = dma.done.wait [#allocation3], 256  }
   0xd   :  { %85 = vsyncadd [#allocation3], 4294967040  ;;  %s89_s11 = smov [#allocation5]   ;;  %v21_v0 = vld [vmem:[#allocation2] sm:$0xff]  ;;  %v22_v1 = vld [vmem:[#allocation2 + $0x8] sm:$0xff] }
   0xe   :  { %s33_s12 = sshll.u32 %s89_s11, 4  ;;  %v23_v2 = vmax.f32 %v21_v0, 0.0  ;;  %v24_v3 = vmax.f32 %v22_v1, 0.0  ;;  %s34_s12 = int_to_ptr.vmem [resolvable:$true] %s33_s12 }
   0xf   :  { %s64_s13 = scalar_lea.vmem %s34_s12, 256  ;;  %p69_p6 = scmp.lt.s32.totalorder %s34_s12, %s34_s12 }
  0x10   :  { %25 = vst [vmem:[#allocation5] sm:$0xff] %v23_v2  ;;  %26 = vst [vmem:[#allocation5 + $0x8] sm:$0xff] %v24_v3  ;;  %p65_p5 = scmp.ne.s32.totalorder %s34_s12, %s64_s13  ;;  %p70_p7 = scmp.lt.s32.totalorder %s64_s13, %s64_s13 }
  0x12   :  { %p71_p8 = por %p70_p7, %p69_p6 }
  0x14   :  { %p72_p9 = pnand %p71_p8, %p65_p5 }
  0x16   :  { %75 = shalt.err (!%p72_p9)
}
  0x17   :  { %36 = dma.vmem_to_hbm [thread:$0]  %s34_s12, 256, %s107_s1, [#allocation4]  }
  0x18   :  { %86 = dma.done.wait [#allocation4], 256  }
  0x19   :  { %87 = vsyncadd [#allocation4], 4294967040 }
  0x1a   :  { %40 = vsyncpa [#allocation3], 1 }
  0x1b   :  { %41 = vsyncpa [#allocation4], 1 }

</bundles_post_ra>
